<compile_context>
chip_gen: v6e
topology: v6e:2x2x1
jax: 0.10.0
libtpu: 0.0.40
codegen_flags: <defaults>
</compile_context>

<pallas_src>
import functools

import jax
import jax.numpy as jnp
from jax.experimental import pallas as pl
from jax.experimental.pallas import tpu as pltpu

BN_EPS = 1e-5


def _cdiv(a, b):
    return -(-a // b)


def _round_up(a, m):
    return _cdiv(a, m) * m


def _vmem_capacity_bytes():
    try:
        return int(pltpu.get_tpu_info().vmem_capacity_bytes)
    except Exception:
        return 64 << 20  # conservative (v7x per-TC VMEM)


# ----------------------------------------------------------------------------
# Kernel
# ----------------------------------------------------------------------------
def _decoder_kernel(x_ref, vecs_ref, w1_ref, b1_ref, w2_ref, b2_ref, out_ref):
    # x: (tm, H) caller dtype.  vecs: (2, H) f32 = [scale1; shift1].
    x = x_ref[...].astype(jnp.float32)
    scale1 = vecs_ref[0:1, :]
    shift1 = vecs_ref[1:2, :]

    # ---- bn1 (folded) + relu ----  (dropout = identity in eval mode)
    h = jnp.maximum(x * scale1 + shift1, 0.0)

    # ---- internal_linear with bn2 folded into W1/bias1, then relu ----
    h = jnp.dot(h.astype(w1_ref.dtype), w1_ref[...],
                preferred_element_type=jnp.float32) + b1_ref[...]
    h = jnp.maximum(h, 0.0)

    # ---- projective_linear (lane-dense padded output columns) ----
    y = jnp.dot(h.astype(w2_ref.dtype), w2_ref[...],
                preferred_element_type=jnp.float32) + b2_ref[...]
    out_ref[...] = y.astype(out_ref.dtype)


# ----------------------------------------------------------------------------
# One-time parameter preparation (hoisted out of the per-call path)
# ----------------------------------------------------------------------------
def prepare_params(params):
    """Fold eval-mode BatchNorms, cast weights to bf16, zero-pad to 128-lanes.

    Call ONCE; reuse the returned dict for every forward call.
    """
    H = params["w1"].shape[0]
    C = params["w2"].shape[1]
    Hpad = _round_up(H, 128)
    Cpad = _round_up(C, 128)

    scale1 = params["g1"] * jax.lax.rsqrt(params["rv1"] + BN_EPS)
    shift1 = params["b1"] - params["rm1"] * scale1
    scale2 = params["g2"] * jax.lax.rsqrt(params["rv2"] + BN_EPS)
    w1_f = params["w1"] * scale2[None, :]                       # (H, H)
    bias1_f = (params["bias1"] - params["rm2"]) * scale2 + params["b2"]

    vecs = jnp.stack([scale1, shift1], axis=0).astype(jnp.float32)       # (2, H)
    w1_p = jnp.zeros((H, Hpad), jnp.bfloat16).at[:, :H].set(
        w1_f.astype(jnp.bfloat16))                                        # (H, Hpad)
    b1_p = jnp.zeros((1, Hpad), jnp.float32).at[0, :H].set(
        bias1_f.astype(jnp.float32))                                      # (1, Hpad)
    w2_p = jnp.zeros((Hpad, Cpad), jnp.bfloat16).at[:H, :C].set(
        params["w2"].astype(jnp.bfloat16))                                # (Hpad, Cpad)
    b2_p = jnp.zeros((1, Cpad), jnp.float32).at[0, :C].set(
        params["bias2"].astype(jnp.float32))                              # (1, Cpad)

    return dict(vecs=vecs, w1=w1_p, bias1=b1_p, w2=w2_p, bias2=b2_p,
                num_classes=C)


# ----------------------------------------------------------------------------
# Forward
# ----------------------------------------------------------------------------
@functools.partial(jax.jit, static_argnames=("num_classes",))
def _forward(x, vecs, w1, b1, w2, b2, *, num_classes):
    B, H = x.shape
    Hpad = w1.shape[1]
    Cpad = w2.shape[1]
    x_itemsize = jnp.dtype(x.dtype).itemsize
    rH = _round_up(H, 128)  # lane-padded H for VMEM accounting

    # --- batch tile: megacore-friendly (>=2 grid steps once B > 128) ---
    if B <= 128:
        tm = B                                   # single full-dim tile (always legal)
    else:
        tm = min(512, _round_up(_cdiv(B, 2), 128))

    # --- VMEM plan: resident weights single-buffered, x/out double-buffered ---
    resident = (
        _round_up(H, 8) * Hpad * 2          # W1 bf16
        + Hpad * Cpad * 2                   # W2 bf16
        + 8 * (rH + Hpad + Cpad) * 4        # vecs / bias1 / bias2 (sublane-padded)
    )

    def plan_bytes(t):
        return resident + 2 * t * (rH * x_itemsize + Cpad * 4)

    cap = _vmem_capacity_bytes()
    budget = max(cap - (8 << 20), 16 << 20)
    while plan_bytes(tm) > budget and tm > 8:
        tm = max(8, _round_up(tm // 2, 8))
    vmem_bytes = int(min(max(plan_bytes(tm) + (4 << 20), 16 << 20), cap))

    grid = (_cdiv(B, tm),)

    cost = pl.CostEstimate(
        flops=2 * B * H * Hpad + 2 * B * Hpad * Cpad,
        transcendentals=0,
        bytes_accessed=int(B * H * x_itemsize + B * Cpad * 4
                           + w1.size * 2 + w2.size * 2
                           + (vecs.size + b1.size + b2.size) * 4),
    )

    single = pl.Buffered(buffer_count=1)  # resident operands: DMA'd once
    out = pl.pallas_call(
        _decoder_kernel,
        out_shape=jax.ShapeDtypeStruct((B, Cpad), jnp.float32),
        grid=grid,
        in_specs=[
            pl.BlockSpec((tm, H), lambda i: (i, 0)),                          # x (streamed)
            pl.BlockSpec((2, H), lambda i: (0, 0), pipeline_mode=single),     # scale1/shift1
            pl.BlockSpec((H, Hpad), lambda i: (0, 0), pipeline_mode=single),  # W1 (resident)
            pl.BlockSpec((1, Hpad), lambda i: (0, 0), pipeline_mode=single),  # bias1 folded
            pl.BlockSpec((Hpad, Cpad), lambda i: (0, 0), pipeline_mode=single),  # W2
            pl.BlockSpec((1, Cpad), lambda i: (0, 0), pipeline_mode=single),  # bias2
        ],
        out_specs=pl.BlockSpec((tm, Cpad), lambda i: (i, 0)),
        compiler_params=pltpu.CompilerParams(
            dimension_semantics=("parallel",),
            vmem_limit_bytes=vmem_bytes,
        ),
        cost_estimate=cost,
    )(x, vecs, w1, b1, w2, b2)

    return out[:, :num_classes]


def linear_decoder_v2(x, prep):
    """x: [B, H] (or [H]). Returns [B, num_classes] (squeezed if B == 1)."""
    if x.ndim == 1:
        x = x[None, :]
    y = _forward(x, prep["vecs"], prep["w1"], prep["bias1"], prep["w2"],
                 prep["bias2"], num_classes=prep["num_classes"])
    # match torch's y_hat.squeeze(0)
    if y.shape[0] == 1:
        y = y[0]
    return y


# ----------------------------------------------------------------------------
# Parameter init + pure-JAX reference (for the correctness check)
# ----------------------------------------------------------------------------
def init_params(key, hidden_size, num_classes):
    ks = jax.random.split(key, 12)
    # BatchNorm1d affine params + NON-trivial running stats so BN folding is
    # actually exercised by the correctness check.
    g1 = 1.0 + 0.1 * jax.random.normal(ks[0], (hidden_size,), jnp.float32)
    b1 = 0.1 * jax.random.normal(ks[1], (hidden_size,), jnp.float32)
    g2 = 1.0 + 0.1 * jax.random.normal(ks[2], (hidden_size,), jnp.float32)
    b2 = 0.1 * jax.random.normal(ks[3], (hidden_size,), jnp.float32)
    rm1 = 0.3 * jax.random.normal(ks[4], (hidden_size,), jnp.float32)
    rv1 = 0.5 + jax.random.uniform(ks[5], (hidden_size,), jnp.float32)
    rm2 = 0.3 * jax.random.normal(ks[6], (hidden_size,), jnp.float32)
    rv2 = 0.5 + jax.random.uniform(ks[7], (hidden_size,), jnp.float32)

    # nn.Linear weights are (out, in); store transposed (in, out) for x @ W.
    lim1 = 1.0 / jnp.sqrt(hidden_size)
    w1_t = jax.random.uniform(ks[8], (hidden_size, hidden_size), jnp.float32,
                              -lim1, lim1)
    bias1 = jax.random.uniform(ks[9], (hidden_size,), jnp.float32, -lim1, lim1)
    w2_t = jax.random.uniform(ks[10], (hidden_size, num_classes), jnp.float32,
                              -lim1, lim1)
    bias2 = jax.random.uniform(ks[11], (num_classes,), jnp.float32, -lim1, lim1)

    return dict(g1=g1, b1=b1, rm1=rm1, rv1=rv1, w1=w1_t, bias1=bias1,
                g2=g2, b2=b2, rm2=rm2, rv2=rv2, w2=w2_t, bias2=bias2)


def reference(x, p):
    """Pure-JAX f32 reference matching the PyTorch eval-mode forward (unfolded)."""
    h = (x - p["rm1"]) / jnp.sqrt(p["rv1"] + BN_EPS) * p["g1"] + p["b1"]
    h = jnp.maximum(h, 0.0)
    h = h @ p["w1"] + p["bias1"]
    h = (h - p["rm2"]) / jnp.sqrt(p["rv2"] + BN_EPS) * p["g2"] + p["b2"]
    h = jnp.maximum(h, 0.0)
    return h @ p["w2"] + p["bias2"]


if __name__ == "__main__":
    B, H, C = 8, 32, 10   # batch, hidden_size, num_classes
    key = jax.random.PRNGKey(0)
    kx, kp = jax.random.split(key)
    x = jax.random.normal(kx, (B, H), jnp.float32)
    params = init_params(kp, H, C)

    prep = prepare_params(params)          # one-time fold / cast / pad
    y = linear_decoder_v2(x, prep)
    y = jax.block_until_ready(y)

    y_ref = reference(x, params)
    assert y.shape == (B, C)
    # bf16 weights -> loose-ish tolerance vs the f32 reference.
    assert jnp.allclose(y, y_ref, atol=5e-2, rtol=5e-2), \
        f"max abs err {jnp.max(jnp.abs(y - y_ref))}"
    print("KERNEL_OK")
</pallas_src>

<mosaic_0001>
module attributes {stable_mosaic.version = 11 : i64} {
  func.func @_decoder_kernel(%arg0: i32, %arg1: memref<8x32xf32, #tpu.memory_space<vmem>>, %arg2: memref<2x32xf32, #tpu.memory_space<vmem>>, %arg3: memref<32x128xbf16, #tpu.memory_space<vmem>>, %arg4: memref<1x128xf32, #tpu.memory_space<vmem>>, %arg5: memref<128x128xbf16, #tpu.memory_space<vmem>>, %arg6: memref<1x128xf32, #tpu.memory_space<vmem>>, %arg7: memref<8x128xf32, #tpu.memory_space<vmem>>) attributes {dimension_semantics = [#tpu.dimension_semantics<parallel>], iteration_bounds = array<i64: 1>, scalar_prefetch = 0 : i64, scratch_operands = 0 : i64, tpu.core_type = #tpu.core_type<tc>, window_params = [{transform_indices = @transform_0, window_bounds = array<i64: 8, 32>}, {pipeline_mode = #tpu.pipeline_mode<synchronous>, transform_indices = @transform_1, window_bounds = array<i64: 2, 32>}, {pipeline_mode = #tpu.pipeline_mode<synchronous>, transform_indices = @transform_2, window_bounds = array<i64: 32, 128>}, {pipeline_mode = #tpu.pipeline_mode<synchronous>, transform_indices = @transform_3, window_bounds = array<i64: 1, 128>}, {pipeline_mode = #tpu.pipeline_mode<synchronous>, transform_indices = @transform_4, window_bounds = array<i64: 128, 128>}, {pipeline_mode = #tpu.pipeline_mode<synchronous>, transform_indices = @transform_5, window_bounds = array<i64: 1, 128>}, {transform_indices = @transform_6, window_bounds = array<i64: 8, 128>}]} {
    %c0 = arith.constant 0 : index
    %c0_0 = arith.constant 0 : index
    %0 = vector.load %arg1[%c0, %c0_0] : memref<8x32xf32, #tpu.memory_space<vmem>>, vector<8x32xf32>
    %c0_1 = arith.constant 0 : index
    %c0_2 = arith.constant 0 : index
    %1 = vector.load %arg2[%c0_1, %c0_2] : memref<2x32xf32, #tpu.memory_space<vmem>>, vector<1x32xf32>
    %c1 = arith.constant 1 : index
    %c0_3 = arith.constant 0 : index
    %2 = vector.load %arg2[%c1, %c0_3] : memref<2x32xf32, #tpu.memory_space<vmem>>, vector<1x32xf32>
    %3 = vector.broadcast %1 : vector<1x32xf32> to vector<8x32xf32>
    %4 = arith.mulf %0, %3 : vector<8x32xf32>
    %5 = vector.broadcast %2 : vector<1x32xf32> to vector<8x32xf32>
    %6 = arith.addf %4, %5 : vector<8x32xf32>
    %cst = arith.constant 0.000000e+00 : f32
    %7 = vector.broadcast %cst : f32 to vector<8x32xf32>
    %8 = arith.maximumf %6, %7 : vector<8x32xf32>
    %9 = arith.truncf %8 : vector<8x32xf32> to vector<8x32xbf16>
    %c0_4 = arith.constant 0 : index
    %c0_5 = arith.constant 0 : index
    %10 = vector.load %arg3[%c0_4, %c0_5] : memref<32x128xbf16, #tpu.memory_space<vmem>>, vector<32x128xbf16>
    %cst_6 = arith.constant dense<0.000000e+00> : vector<8x128xf32>
    %11 = tpu.matmul %9, %10, %cst_6 {dimension_numbers = #tpu.dot_dimension_numbers<[1], [0], [0], [1], [0, 0, 1, 1], [], []>} : vector<8x32xbf16>, vector<32x128xbf16>, vector<8x128xf32> -> vector<8x128xf32>
    %c0_7 = arith.constant 0 : index
    %c0_8 = arith.constant 0 : index
    %12 = vector.load %arg4[%c0_7, %c0_8] : memref<1x128xf32, #tpu.memory_space<vmem>>, vector<1x128xf32>
    %13 = vector.broadcast %12 : vector<1x128xf32> to vector<8x128xf32>
    %14 = arith.addf %11, %13 : vector<8x128xf32>
    %cst_9 = arith.constant 0.000000e+00 : f32
    %15 = vector.broadcast %cst_9 : f32 to vector<8x128xf32>
    %16 = arith.maximumf %14, %15 : vector<8x128xf32>
    %17 = arith.truncf %16 : vector<8x128xf32> to vector<8x128xbf16>
    %c0_10 = arith.constant 0 : index
    %c0_11 = arith.constant 0 : index
    %18 = vector.load %arg5[%c0_10, %c0_11] : memref<128x128xbf16, #tpu.memory_space<vmem>>, vector<128x128xbf16>
    %cst_12 = arith.constant dense<0.000000e+00> : vector<8x128xf32>
    %19 = tpu.matmul %17, %18, %cst_12 {dimension_numbers = #tpu.dot_dimension_numbers<[1], [0], [0], [1], [0, 0, 1, 1], [], []>} : vector<8x128xbf16>, vector<128x128xbf16>, vector<8x128xf32> -> vector<8x128xf32>
    %c0_13 = arith.constant 0 : index
    %c0_14 = arith.constant 0 : index
    %20 = vector.load %arg6[%c0_13, %c0_14] : memref<1x128xf32, #tpu.memory_space<vmem>>, vector<1x128xf32>
    %21 = vector.broadcast %20 : vector<1x128xf32> to vector<8x128xf32>
    %22 = arith.addf %19, %21 : vector<8x128xf32>
    %c0_15 = arith.constant 0 : index
    %c0_16 = arith.constant 0 : index
    %23 = vector.load %arg7[%c0_15, %c0_16] : memref<8x128xf32, #tpu.memory_space<vmem>>, vector<8x128xf32>
    tpu.vector_store %arg7[%c0_15, %c0_16], %22 {strides = array<i32>} : memref<8x128xf32, #tpu.memory_space<vmem>>, vector<8x128xf32>,
    return
  }
  func.func @transform_0(%arg0: i32) -> (i32, i32) {
    %c0_i32 = arith.constant 0 : i32
    %c0_i32_0 = arith.constant 0 : i32
    return %arg0, %c0_i32 : i32, i32
  }
  func.func @transform_1(%arg0: i32) -> (i32, i32) {
    %c0_i32 = arith.constant 0 : i32
    %c0_i32_0 = arith.constant 0 : i32
    %c0_i32_1 = arith.constant 0 : i32
    return %c0_i32, %c0_i32_0 : i32, i32
  }
  func.func @transform_2(%arg0: i32) -> (i32, i32) {
    %c0_i32 = arith.constant 0 : i32
    %c0_i32_0 = arith.constant 0 : i32
    %c0_i32_1 = arith.constant 0 : i32
    return %c0_i32, %c0_i32_0 : i32, i32
  }
  func.func @transform_3(%arg0: i32) -> (i32, i32) {
    %c0_i32 = arith.constant 0 : i32
    %c0_i32_0 = arith.constant 0 : i32
    %c0_i32_1 = arith.constant 0 : i32
    return %c0_i32, %c0_i32_0 : i32, i32
  }
  func.func @transform_4(%arg0: i32) -> (i32, i32) {
    %c0_i32 = arith.constant 0 : i32
    %c0_i32_0 = arith.constant 0 : i32
    %c0_i32_1 = arith.constant 0 : i32
    return %c0_i32, %c0_i32_0 : i32, i32
  }
  func.func @transform_5(%arg0: i32) -> (i32, i32) {
    %c0_i32 = arith.constant 0 : i32
    %c0_i32_0 = arith.constant 0 : i32
    %c0_i32_1 = arith.constant 0 : i32
    return %c0_i32, %c0_i32_0 : i32, i32
  }
  func.func @transform_6(%arg0: i32) -> (i32, i32) {
    %c0_i32 = arith.constant 0 : i32
    %c0_i32_0 = arith.constant 0 : i32
    return %arg0, %c0_i32 : i32, i32
  }
}

</mosaic_0001>

<bundles_post_ra>
// kernel: _forward.1
= control target key start
LH: loop header
LB: loop body
LE: loop exit
PB: predicated region body
PF: predicated region fallthrough
CT: control target
= control target key end

     0   :  { %11 = vsyncpa [#allocation3], 0  ;;  %s536_s0 = inlined_call_operand.hbm [shape: f32[8,32], index: 0, kind: input, shape index: {}]   ;;  %s537_s1 = inlined_call_operand.hbm [shape: f32[2,32], index: 1, kind: input, shape index: {}]   ;;  %s538_s2 = inlined_call_operand.hbm [shape: bf16[32,128], index: 2, kind: input, shape index: {}]   ;;  %s539_s3 = inlined_call_operand.vmem [shape: f32[1,128], index: 3, kind: input, shape index: {}]   ;;  %s540_s4 = inlined_call_operand.hbm [shape: bf16[128,128], index: 4, kind: input, shape index: {}]   ;;  %s541_s5 = inlined_call_operand.vmem [shape: f32[1,128], index: 5, kind: input, shape index: {}]   ;;  %s542_s6 = inlined_call_operand.hbm [shape: f32[8,128], index: 6, kind: output, shape index: {}]  }
   0x1   :  { %12 = vsyncpa [#allocation6], 0 }
   0x2   :  { %13 = vsyncpa [#allocation9], 0 }
   0x3   :  { %14 = vsyncpa [#allocation4], 0  ;;  %s471_s21 = smov [#allocation5]   ;;  %s472_s23 = smov [#allocation2]  }
   0x4   :  { %s31_s22 = sshll.u32 %s471_s21, 4  ;;  %s21_s24 = sshll.u32 %s472_s23, 4  ;;  %s32_s22 = int_to_ptr.vmem [resolvable:$true] %s31_s22  ;;  %s22_s24 = int_to_ptr.vmem [resolvable:$true] %s21_s24 }
   0x5   :  { %s371_s25 = scalar_lea.vmem %s32_s22, 32  ;;  %p376_p1 = scmp.lt.s32.totalorder %s32_s22, %s32_s22 }
   0x6   :  { %p372_p0 = scmp.ne.s32.totalorder %s32_s22, %s371_s25  ;;  %p377_p2 = scmp.lt.s32.totalorder %s371_s25, %s371_s25 }
   0x8   :  { %p378_p3 = por %p377_p2, %p376_p1 }
   0xa   :  { %p379_p4 = pnand %p378_p3, %p372_p0 }
   0xc   :  { %382 = shalt.err (!%p379_p4)
}
   0xd   :  { %34 = dma.hbm_to_vmem [thread:$0]  %s537_s1, 32, %s32_s22, [#allocation6]  }
   0xe   :  { %s391_s28 = scalar_lea.vmem %s22_s24, 128  ;;  %p396_p6 = scmp.lt.s32.totalorder %s22_s24, %s22_s24 }
   0xf   :  { %p392_p5 = scmp.ne.s32.totalorder %s22_s24, %s391_s28  ;;  %p397_p7 = scmp.lt.s32.totalorder %s391_s28, %s391_s28 }
  0x11   :  { %p398_p8 = por %p397_p7, %p396_p6 }
  0x13   :  { %p399_p9 = pnand %p398_p8, %p392_p5 }
  0x15   :  { %402 = shalt.err (!%p399_p9)
}
  0x16   :  { %24 = dma.hbm_to_vmem [thread:$0]  %s536_s0, 128, %s22_s24, [#allocation3]  }
  0x17   :  { %s473_s7 = smov [#allocation7]  }
  0x18   :  { %s40_s8 = sshll.u32 %s473_s7, 4  ;;  %s41_s8 = int_to_ptr.vmem [resolvable:$true] %s40_s8 }
  0x19   :  { %s411_s9 = scalar_lea.vmem %s41_s8, 256  ;;  %p416_p11 = scmp.lt.s32.totalorder %s41_s8, %s41_s8 }
  0x1a   :  { %p412_p10 = scmp.ne.s32.totalorder %s41_s8, %s411_s9  ;;  %p417_p12 = scmp.lt.s32.totalorder %s411_s9, %s411_s9 }
  0x1c   :  { %p418_p13 = por %p417_p12, %p416_p11 }
  0x1e   :  { %p419_p0 = pnand %p418_p13, %p412_p10 }
  0x20   :  { %422 = shalt.err (!%p419_p0)
}
  0x21   :  { %s474_s1 = smov 64   ;;  %s475_s10 = smov 4  }
  0x22   :  { %46 = dma.hbm_to_vmem [thread:$0]  %s538_s2, 256, %s41_s8, [#allocation6], %s474_s1, %s474_s1, %s475_s10  }
  0x23   :  { %s476_s13 = smov [#allocation8]  }
  0x24   :  { %s54_s14 = sshll.u32 %s476_s13, 4  ;;  %s55_s14 = int_to_ptr.vmem [resolvable:$true] %s54_s14 }
  0x25   :  { %s431_s0 = scalar_lea.vmem %s55_s14, 1024  ;;  %p436_p2 = scmp.lt.s32.totalorder %s55_s14, %s55_s14 }
  0x26   :  { %p432_p1 = scmp.ne.s32.totalorder %s55_s14, %s431_s0  ;;  %p437_p3 = scmp.lt.s32.totalorder %s431_s0, %s431_s0 }
  0x28   :  { %p438_p4 = por %p437_p3, %p436_p2 }
  0x2a   :  { %p439_p5 = pnand %p438_p4, %p432_p1 }
  0x2c   :  { %442 = shalt.err (!%p439_p5)
}
  0x2d   :  { %60 = dma.hbm_to_vmem [thread:$0]  %s540_s4, 1024, %s55_s14, [#allocation9], %s474_s1, %s474_s1, %s475_s10  }
  0x2e   :  { %463 = dma.done.wait [#allocation3], 128  }
  0x2f   :  { %464 = vsyncadd [#allocation3], 4294967168 }
  0x30   :  { %465 = dma.done.wait [#allocation6], 288  }
  0x31   :  { %466 = vsyncadd [#allocation6], 4294967008 }
  0x32   :  { %467 = dma.done.wait [#allocation9], 1024  }
  0x33   :  { %468 = vsyncadd [#allocation9], 4294966272  ;;  %v477_v0 = vmov 0.0   ;;  %vm478_vm0 = vmmov 0   ;;  %v353_v1 = vld [vmem:[#allocation7 + $0x8] sm:$0xff]   ;;  %v354_v2 = vld [vmem:[#allocation7] sm:$0xff]  }
  0x34   :  { %316 = vmatprep.subr.bf16.mxu0 %v477_v0  ;;  %320 = vmatprep.mubr.msk.bf16.mxu0 %vm478_vm0, %v477_v0  ;;  %v76_v3 = vld [vmem:[#allocation2] sm:$0xff]  ;;  %v289_v4 = vld [vmem:[#allocation5] ss:$0 sm:$0xff]  ;;  %v290_v5 = vld [vmem:[#allocation5 + $0x1] ss:$0 sm:$0xff]  ;;  %vm114_vm1 = vcmask 261120  }
  0x35   :  { %324 = vmatprep.subr.bf16.mxu1 %v477_v0  ;;  %340 = vmatprep.mubr.msk.bf16.mxu1 %vm478_vm0, %v477_v0  ;;  %v83_v6 = vmul.f32 %v289_v4, %v76_v3  ;;  %v355_v7 = vld [vmem:[#allocation8 + $0x38] sm:$0xff]   ;;  %v356_v9 = vld [vmem:[#allocation8 + $0x30] sm:$0xff]   ;;  %v357_v12 = vld [vmem:[#allocation8 + $0x28] sm:$0xff]   ;;  %s479_s19 = smov [#allocation10]  }
  0x36   :  { %317 = vmatpush3.bf16.msra.mxu0 %v353_v1  ;;  %325 = vmatpush3.bf16.msra.mxu1 %v355_v7  ;;  %v358_v13 = vld [vmem:[#allocation8 + $0x20] sm:$0xff]   ;;  %v359_v14 = vld [vmem:[#allocation8 + $0x18] sm:$0xff]   ;;  %v360_v15 = vld [vmem:[#allocation8 + $0x10] sm:$0xff]   ;;  %s278_s20 = sshll.u32 %s479_s19, 4  ;;  %s279_s20 = int_to_ptr.vmem [resolvable:$true] %s278_s20 }
  0x37   :  { %318 = vmatprep.subr.bf16.mxu0 %v477_v0  ;;  %v88_v8 = vadd.f32 %v290_v5, %v83_v6  ;;  %326 = vmatprep.subr.bf16.mxu1 %v477_v0  ;;  %v361_v16 = vld [vmem:[#allocation8 + $0x8] sm:$0xff]   ;;  %v362_v17 = vld [vmem:[#allocation8] sm:$0xff]   ;;  %p448_p7 = scmp.lt.s32.totalorder %s279_s20, %s279_s20 }
  0x38   :  { %v291_v18 = vld [vmem:[%s539_s3] ss:$0 sm:$0xff]  ;;  %s443_s3 = scalar_lea.vmem %s279_s20, 128 }
  0x39   :  { %v89_v10 = vmax.f32 %v88_v8, 0.0  ;;  %v295_v26 = vld [vmem:[%s541_s5] ss:$0 sm:$0xff]  ;;  %p444_p6 = scmp.ne.s32.totalorder %s279_s20, %s443_s3  ;;  %p449_p8 = scmp.lt.s32.totalorder %s443_s3, %s443_s3 }
  0x3a   :  { %319 = vmatpush3.bf16.msra.mxu0 %v354_v2  ;;  %327 = vmatpush3.bf16.msra.mxu1 %v356_v9 }
  0x3b   :  { %v90_v11 = vpack.c.bf16 %v89_v10, %v89_v10  ;;  %328 = vmatprep.subr.bf16.mxu1 %v477_v0  ;;  %p450_p9 = por %p449_p8, %p448_p7 }
  0x3d   :  { %321 = vmatmul.mubr.msk.bf16.vlgmr.msra.gmra.mxu0 %vm114_vm1, %v90_v11  ;;  %p451_p10 = pnand %p450_p9, %p444_p6 }
  0x3e   :  { %329 = vmatpush3.bf16.msra.mxu1 %v357_v12 }
  0x3f   :  { %330 = vmatprep.subr.bf16.mxu1 %v477_v0 }
  0x42   :  { %331 = vmatpush3.bf16.msra.mxu1 %v358_v13 }
  0x43   :  { %332 = vmatprep.subr.bf16.mxu1 %v477_v0 }
  0x46   :  { %333 = vmatpush3.bf16.msra.mxu1 %v359_v14 }
  0x47   :  { %334 = vmatprep.subr.bf16.mxu1 %v477_v0 }
  0x4a   :  { %335 = vmatpush3.bf16.msra.mxu1 %v360_v15 }
  0x4b   :  { %336 = vmatprep.subr.bf16.mxu1 %v477_v0 }
  0x4e   :  { %337 = vmatpush3.bf16.msra.mxu1 %v361_v16 }
  0x4f   :  { %338 = vmatprep.subr.bf16.mxu1 %v477_v0 }
  0x52   :  { %339 = vmatpush3.bf16.msra.mxu1 %v362_v17 }
  0xfd   :  { %v152_v19 = vpop.f32.mrf.mxu0 }
  0xfe   :  { %v153_v20 = vadd.f32 %v291_v18, %v152_v19 }
  0xff   :  { %v322_v21 = vpop.f32.mrf.mxu0 }
 0x100   :  { %v158_v22 = vmax.f32 %v153_v20, 0.0 }
 0x101   :  { %v155_v23 = vpop.f32.mrf.mxu0 }
 0x102   :  { %v159_v24 = vpack.c.bf16 %v158_v22, %v158_v22 }
 0x103   :  { %v323_v25 = vpop.f32.mrf.mxu0 }
 0x104   :  { %341 = vmatmul.mubr.bf16.vlgmr.msra.gmra.mxu1 %v159_v24 }
 0x1c4   :  { %v265_v27 = vpop.f32.mrf.mxu1 }
 0x1c5   :  { %v266_v28 = vadd.f32 %v295_v26, %v265_v27 }
 0x1c6   :  { %v342_v29 = vpop.f32.mrf.mxu1 }
 0x1c7   :  { %271 = vst [vmem:[#allocation10] sm:$0xff] %v266_v28 }
 0x1c8   :  { %v268_v30 = vpop.f32.mrf.mxu1 }
 0x1c9   :  { %454 = shalt.err (!%p451_p10)
}
 0x1ca   :  { %281 = dma.vmem_to_hbm [thread:$0]  %s279_s20, 128, %s542_s6, [#allocation4]   ;;  %v343_v31 = vpop.f32.mrf.mxu1 }
 0x1cb   :  { %469 = dma.done.wait [#allocation4], 128  }
 0x1cc   :  { %470 = vsyncadd [#allocation4], 4294967168 }
 0x1cd   :  { %285 = vsyncpa [#allocation3], 1 }
 0x1ce   :  { %286 = vsyncpa [#allocation6], 1 }
 0x1cf   :  { %287 = vsyncpa [#allocation9], 1 }
 0x1d0   :  { %288 = vsyncpa [#allocation4], 1 }

</bundles_post_ra>
